<compile_context>
chip_gen: v7x
topology: tpu7x:2x2x1
jax: 0.10.0
libtpu: 0.0.40
codegen_flags: <defaults>
</compile_context>

<pallas_src>
import functools

import jax
import jax.numpy as jnp
from jax.experimental import pallas as pl
from jax.experimental.pallas import tpu as pltpu

INPUT_DIM = 50
HIDDEN = 128
OUT_DIM = 2
PAD_OUT = HIDDEN   # w4/b4 padded to 128 lanes for the MXU; only OUT_DIM lanes stored


def _round_up(x, m):
    return ((x + m - 1) // m) * m


def _cdiv(a, b):
    return (a + b - 1) // b


def mlp_kernel(x_ref, w1_ref, w2_ref, w3_ref, w4_ref, b_ref, o_ref):
    # MXU compute dtype comes from the (pre-cast) weights: bf16 (default) or f32.
    cdt = w1_ref.dtype
    x = x_ref[...].astype(cdt)
    b = b_ref[...]                      # (8, 128) f32 slab: rows 0..3 = b1..b4

    # Layer 1: (bt, 50) @ (50, 128); f32 accumulation, f32 bias + ReLU on the VPU.
    h = jnp.dot(x, w1_ref[...], preferred_element_type=jnp.float32)
    h = jnp.maximum(h + b[0:1, :], 0.0)
    # Layer 2
    h = jnp.dot(h.astype(cdt), w2_ref[...], preferred_element_type=jnp.float32)
    h = jnp.maximum(h + b[1:2, :], 0.0)
    # Layer 3
    h = jnp.dot(h.astype(cdt), w3_ref[...], preferred_element_type=jnp.float32)
    h = jnp.maximum(h + b[2:3, :], 0.0)
    # Layer 4 (no activation): matmul runs at PAD_OUT lanes for the MXU, but
    # only the true OUT_DIM lanes are stored (lane-narrow output, no HBM waste).
    o = jnp.dot(h.astype(cdt), w4_ref[...], preferred_element_type=jnp.float32)
    o = o + b[3:4, :]
    o_ref[...] = o[:, :OUT_DIM].astype(o_ref.dtype)


def prepare_params(params, use_bf16=True):
    """One-time padding / layout prep (call once, outside the forward path).

    w1: (50, 128)  unchanged (no K padding)
    w4: (128, 128) zero-padded on the output lanes (only first OUT_DIM are real)
    biases: packed into one (8, 128) f32 slab, rows 0..3 = b1, b2, b3, b4(padded)
    Weights cast to bf16 by default for the MXU fast path (f32 accumulation).
    """
    wdt = jnp.bfloat16 if use_bf16 else jnp.float32
    w1 = params["w1"].astype(wdt)
    w2 = params["w2"].astype(wdt)
    w3 = params["w3"].astype(wdt)
    w4 = jnp.zeros((HIDDEN, PAD_OUT), jnp.float32).at[:, :OUT_DIM].set(
        params["w4"]).astype(wdt)
    biases = jnp.zeros((8, HIDDEN), jnp.float32)
    biases = biases.at[0, :].set(params["b1"])
    biases = biases.at[1, :].set(params["b2"])
    biases = biases.at[2, :].set(params["b3"])
    biases = biases.at[3, :OUT_DIM].set(params["b4"])
    return dict(w1=w1, w2=w2, w3=w3, w4=w4, biases=biases)


@functools.partial(jax.jit, static_argnames=("batch_tile",))
def simple_nn_forward(x, padded, batch_tile=1024):
    """x: (B, INPUT_DIM) float32 (or bf16). padded: output of prepare_params()."""
    B = x.shape[0]
    # Big tiles amortize the ~0.35us per-grid-step overhead, but keep >=2 grid
    # steps when possible so both v7x TensorCores get a share; 8-row aligned.
    bt = min(batch_tile, _round_up(_cdiv(B, 2), 8), _round_up(B, 8))
    bt = max(8, _round_up(bt, 8))
    # Ragged last block: OOB rows read garbage (row-isolated), writes are masked.
    grid = (_cdiv(B, bt),)

    flops = 2 * B * (INPUT_DIM * HIDDEN + 2 * HIDDEN * HIDDEN + HIDDEN * PAD_OUT)
    wbytes = sum(int(v.size) * v.dtype.itemsize for v in padded.values())
    bytes_accessed = int(x.size) * x.dtype.itemsize + B * OUT_DIM * 4 + wbytes

    xmap = lambda i: (i, 0)
    wmap = lambda i: (0, 0)   # constant index_map: fetched once, VMEM-resident

    out = pl.pallas_call(
        mlp_kernel,
        out_shape=jax.ShapeDtypeStruct((B, OUT_DIM), jnp.float32),
        grid_spec=pltpu.PrefetchScalarGridSpec(
            num_scalar_prefetch=0,
            grid=grid,
            in_specs=[
                pl.BlockSpec((bt, INPUT_DIM), xmap),        # x tile (full 50-wide last dim)
                pl.BlockSpec((INPUT_DIM, HIDDEN), wmap),    # w1 (50, 128)
                pl.BlockSpec((HIDDEN, HIDDEN), wmap),       # w2
                pl.BlockSpec((HIDDEN, HIDDEN), wmap),       # w3
                pl.BlockSpec((HIDDEN, PAD_OUT), wmap),      # w4 (128, 128 padded)
                pl.BlockSpec((8, HIDDEN), wmap),            # packed biases b1..b4
            ],
            out_specs=pl.BlockSpec((bt, OUT_DIM), xmap),    # true 2-lane output
        ),
        compiler_params=pltpu.CompilerParams(
            dimension_semantics=("parallel",)),
        cost_estimate=pl.CostEstimate(
            flops=flops, transcendentals=0, bytes_accessed=bytes_accessed),
    )(x, padded["w1"], padded["w2"], padded["w3"], padded["w4"], padded["biases"])

    return out   # already (B, OUT_DIM); no post-kernel slice


def init_params(key):
    """Deterministic init mimicking nn.Linear's U(-1/sqrt(fan_in), 1/sqrt(fan_in))."""
    keys = jax.random.split(key, 8)

    def lin(kw, kb, fan_in, fan_out):
        bound = 1.0 / jnp.sqrt(jnp.float32(fan_in))
        w = jax.random.uniform(kw, (fan_in, fan_out), jnp.float32, -bound, bound)
        b = jax.random.uniform(kb, (fan_out,), jnp.float32, -bound, bound)
        return w, b

    w1, b1 = lin(keys[0], keys[1], INPUT_DIM, HIDDEN)
    w2, b2 = lin(keys[2], keys[3], HIDDEN, HIDDEN)
    w3, b3 = lin(keys[4], keys[5], HIDDEN, HIDDEN)
    w4, b4 = lin(keys[6], keys[7], HIDDEN, OUT_DIM)
    return dict(w1=w1, b1=b1, w2=w2, b2=b2, w3=w3, b3=b3, w4=w4, b4=b4)


def reference_forward(x, p):
    h = jnp.maximum(x @ p["w1"] + p["b1"], 0.0)
    h = jnp.maximum(h @ p["w2"] + p["b2"], 0.0)
    h = jnp.maximum(h @ p["w3"] + p["b3"], 0.0)
    return h @ p["w4"] + p["b4"]


if __name__ == "__main__":
    key = jax.random.PRNGKey(0)
    kx, kx2, kp = jax.random.split(key, 3)
    params = init_params(kp)

    # One-time layout prep (hoisted out of the forward path).
    padded_f32 = prepare_params(params, use_bf16=False)   # strict-check path
    padded_bf16 = prepare_params(params)                   # default: bf16 MXU fast path

    # 1) Tiny ragged batch (B=4 < 8-row tile): single ragged block, masked stores.
    x = jax.random.normal(kx, (4, INPUT_DIM), dtype=jnp.float32)
    out = jax.block_until_ready(simple_nn_forward(x, padded_f32))
    ref = reference_forward(x, params)
    assert out.shape == (4, OUT_DIM)
    assert jnp.allclose(out, ref, atol=1e-4, rtol=1e-4), "f32 ragged-batch mismatch"

    # 2) Multi-step grid with ragged last block (B=300, bt=128 -> 3 steps), strict f32.
    x2 = jax.random.normal(kx2, (300, INPUT_DIM), dtype=jnp.float32)
    out2 = jax.block_until_ready(simple_nn_forward(x2, padded_f32, batch_tile=128))
    ref2 = reference_forward(x2, params)
    assert out2.shape == (300, OUT_DIM)
    assert jnp.allclose(out2, ref2, atol=1e-4, rtol=1e-4), "f32 tiled-batch mismatch"

    # 3) bf16 MXU-input production path (f32 accumulation), default tile (>=2 grid
    #    steps for v7x) — loose tolerance vs the f32 reference.
    out3 = jax.block_until_ready(simple_nn_forward(x2, padded_bf16))
    assert out3.shape == (300, OUT_DIM)
    assert jnp.allclose(out3, ref2, atol=1e-1, rtol=1e-1), "bf16 path mismatch"

    # TODO(synk): if the 2-lane output DMA ever shows up as descriptor-bound,
    # switch PAD-on-store to 8 lanes or let downstream consume the padded slab.
    print("KERNEL_OK")
</pallas_src>

<mosaic_0001>
module attributes {stable_mosaic.version = 11 : i64} {
  func.func @mlp_kernel(%arg0: i32, %arg1: memref<8x50xf32, #tpu.memory_space<vmem>>, %arg2: memref<50x128xf32, #tpu.memory_space<vmem>>, %arg3: memref<128x128xf32, #tpu.memory_space<vmem>>, %arg4: memref<128x128xf32, #tpu.memory_space<vmem>>, %arg5: memref<128x128xf32, #tpu.memory_space<vmem>>, %arg6: memref<8x128xf32, #tpu.memory_space<vmem>>, %arg7: memref<8x2xf32, #tpu.memory_space<vmem>>) attributes {dimension_semantics = [#tpu.dimension_semantics<parallel>], iteration_bounds = array<i64: 1>, scalar_prefetch = 0 : i64, scratch_operands = 0 : i64, tpu.core_type = #tpu.core_type<tc>, window_params = [{transform_indices = @transform_0, window_bounds = array<i64: 8, 50>}, {pipeline_mode = #tpu.pipeline_mode<synchronous>, transform_indices = @transform_1, window_bounds = array<i64: 50, 128>}, {pipeline_mode = #tpu.pipeline_mode<synchronous>, transform_indices = @transform_2, window_bounds = array<i64: 128, 128>}, {pipeline_mode = #tpu.pipeline_mode<synchronous>, transform_indices = @transform_3, window_bounds = array<i64: 128, 128>}, {pipeline_mode = #tpu.pipeline_mode<synchronous>, transform_indices = @transform_4, window_bounds = array<i64: 128, 128>}, {pipeline_mode = #tpu.pipeline_mode<synchronous>, transform_indices = @transform_5, window_bounds = array<i64: 8, 128>}, {transform_indices = @transform_6, window_bounds = array<i64: 8, 2>}]} {
    %c0 = arith.constant 0 : index
    %c0_0 = arith.constant 0 : index
    %0 = vector.load %arg1[%c0, %c0_0] : memref<8x50xf32, #tpu.memory_space<vmem>>, vector<8x50xf32>
    %c0_1 = arith.constant 0 : index
    %c0_2 = arith.constant 0 : index
    %1 = vector.load %arg6[%c0_1, %c0_2] : memref<8x128xf32, #tpu.memory_space<vmem>>, vector<8x128xf32>
    %c0_3 = arith.constant 0 : index
    %c0_4 = arith.constant 0 : index
    %2 = vector.load %arg2[%c0_3, %c0_4] : memref<50x128xf32, #tpu.memory_space<vmem>>, vector<50x128xf32>
    %cst = arith.constant dense<0.000000e+00> : vector<8x128xf32>
    %3 = tpu.matmul %0, %2, %cst {dimension_numbers = #tpu.dot_dimension_numbers<[1], [0], [0], [1], [0, 0, 1, 1], [], []>} : vector<8x50xf32>, vector<50x128xf32>, vector<8x128xf32> -> vector<8x128xf32>
    %4 = vector.extract_strided_slice %1 {offsets = [0, 0], sizes = [1, 128], strides = [1, 1]} : vector<8x128xf32> to vector<1x128xf32>
    %5 = vector.broadcast %4 : vector<1x128xf32> to vector<8x128xf32>
    %6 = arith.addf %3, %5 : vector<8x128xf32>
    %cst_5 = arith.constant 0.000000e+00 : f32
    %7 = vector.broadcast %cst_5 : f32 to vector<8x128xf32>
    %8 = arith.maximumf %6, %7 : vector<8x128xf32>
    %c0_6 = arith.constant 0 : index
    %c0_7 = arith.constant 0 : index
    %9 = vector.load %arg3[%c0_6, %c0_7] : memref<128x128xf32, #tpu.memory_space<vmem>>, vector<128x128xf32>
    %cst_8 = arith.constant dense<0.000000e+00> : vector<8x128xf32>
    %10 = tpu.matmul %8, %9, %cst_8 {dimension_numbers = #tpu.dot_dimension_numbers<[1], [0], [0], [1], [0, 0, 1, 1], [], []>} : vector<8x128xf32>, vector<128x128xf32>, vector<8x128xf32> -> vector<8x128xf32>
    %11 = vector.extract_strided_slice %1 {offsets = [1, 0], sizes = [1, 128], strides = [1, 1]} : vector<8x128xf32> to vector<1x128xf32>
    %12 = vector.broadcast %11 : vector<1x128xf32> to vector<8x128xf32>
    %13 = arith.addf %10, %12 : vector<8x128xf32>
    %cst_9 = arith.constant 0.000000e+00 : f32
    %14 = vector.broadcast %cst_9 : f32 to vector<8x128xf32>
    %15 = arith.maximumf %13, %14 : vector<8x128xf32>
    %c0_10 = arith.constant 0 : index
    %c0_11 = arith.constant 0 : index
    %16 = vector.load %arg4[%c0_10, %c0_11] : memref<128x128xf32, #tpu.memory_space<vmem>>, vector<128x128xf32>
    %cst_12 = arith.constant dense<0.000000e+00> : vector<8x128xf32>
    %17 = tpu.matmul %15, %16, %cst_12 {dimension_numbers = #tpu.dot_dimension_numbers<[1], [0], [0], [1], [0, 0, 1, 1], [], []>} : vector<8x128xf32>, vector<128x128xf32>, vector<8x128xf32> -> vector<8x128xf32>
    %18 = vector.extract_strided_slice %1 {offsets = [2, 0], sizes = [1, 128], strides = [1, 1]} : vector<8x128xf32> to vector<1x128xf32>
    %19 = vector.broadcast %18 : vector<1x128xf32> to vector<8x128xf32>
    %20 = arith.addf %17, %19 : vector<8x128xf32>
    %cst_13 = arith.constant 0.000000e+00 : f32
    %21 = vector.broadcast %cst_13 : f32 to vector<8x128xf32>
    %22 = arith.maximumf %20, %21 : vector<8x128xf32>
    %c0_14 = arith.constant 0 : index
    %c0_15 = arith.constant 0 : index
    %23 = vector.load %arg5[%c0_14, %c0_15] : memref<128x128xf32, #tpu.memory_space<vmem>>, vector<128x128xf32>
    %cst_16 = arith.constant dense<0.000000e+00> : vector<8x128xf32>
    %24 = tpu.matmul %22, %23, %cst_16 {dimension_numbers = #tpu.dot_dimension_numbers<[1], [0], [0], [1], [0, 0, 1, 1], [], []>} : vector<8x128xf32>, vector<128x128xf32>, vector<8x128xf32> -> vector<8x128xf32>
    %25 = vector.extract_strided_slice %1 {offsets = [3, 0], sizes = [1, 128], strides = [1, 1]} : vector<8x128xf32> to vector<1x128xf32>
    %26 = vector.broadcast %25 : vector<1x128xf32> to vector<8x128xf32>
    %27 = arith.addf %24, %26 : vector<8x128xf32>
    %28 = vector.extract_strided_slice %27 {offsets = [0, 0], sizes = [8, 2], strides = [1, 1]} : vector<8x128xf32> to vector<8x2xf32>
    %c0_17 = arith.constant 0 : index
    %c0_18 = arith.constant 0 : index
    %29 = vector.load %arg7[%c0_17, %c0_18] : memref<8x2xf32, #tpu.memory_space<vmem>>, vector<8x2xf32>
    tpu.vector_store %arg7[%c0_17, %c0_18], %28 {strides = array<i32>} : memref<8x2xf32, #tpu.memory_space<vmem>>, vector<8x2xf32>,
    return
  }
  func.func @transform_0(%arg0: i32) -> (i32, i32) {
    %c0_i32 = arith.constant 0 : i32
    %c0_i32_0 = arith.constant 0 : i32
    return %arg0, %c0_i32 : i32, i32
  }
  func.func @transform_1(%arg0: i32) -> (i32, i32) {
    %c0_i32 = arith.constant 0 : i32
    %c0_i32_0 = arith.constant 0 : i32
    %c0_i32_1 = arith.constant 0 : i32
    return %c0_i32, %c0_i32_0 : i32, i32
  }
  func.func @transform_2(%arg0: i32) -> (i32, i32) {
    %c0_i32 = arith.constant 0 : i32
    %c0_i32_0 = arith.constant 0 : i32
    %c0_i32_1 = arith.constant 0 : i32
    return %c0_i32, %c0_i32_0 : i32, i32
  }
  func.func @transform_3(%arg0: i32) -> (i32, i32) {
    %c0_i32 = arith.constant 0 : i32
    %c0_i32_0 = arith.constant 0 : i32
    %c0_i32_1 = arith.constant 0 : i32
    return %c0_i32, %c0_i32_0 : i32, i32
  }
  func.func @transform_4(%arg0: i32) -> (i32, i32) {
    %c0_i32 = arith.constant 0 : i32
    %c0_i32_0 = arith.constant 0 : i32
    %c0_i32_1 = arith.constant 0 : i32
    return %c0_i32, %c0_i32_0 : i32, i32
  }
  func.func @transform_5(%arg0: i32) -> (i32, i32) {
    %c0_i32 = arith.constant 0 : i32
    %c0_i32_0 = arith.constant 0 : i32
    %c0_i32_1 = arith.constant 0 : i32
    return %c0_i32, %c0_i32_0 : i32, i32
  }
  func.func @transform_6(%arg0: i32) -> (i32, i32) {
    %c0_i32 = arith.constant 0 : i32
    %c0_i32_0 = arith.constant 0 : i32
    return %arg0, %c0_i32 : i32, i32
  }
}

</mosaic_0001>

<bundles_post_ra>
// kernel: simple_nn_forward.1
= control target key start
LH: loop header
LB: loop body
LE: loop exit
PB: predicated region body
PF: predicated region fallthrough
CT: control target
= control target key end

     0   :  { %11 = vsyncpa [#allocation3], 0  ;;  %s1112_s0 = inlined_call_operand.hbm [shape: f32[4,50], index: 0, kind: input, shape index: {}]   ;;  %s1113_s1 = inlined_call_operand.hbm [shape: f32[50,128], index: 1, kind: input, shape index: {}]   ;;  %s1114_s2 = inlined_call_operand.hbm [shape: f32[128,128], index: 2, kind: input, shape index: {}]   ;;  %s1115_s3 = inlined_call_operand.hbm [shape: f32[128,128], index: 3, kind: input, shape index: {}]   ;;  %s1116_s4 = inlined_call_operand.hbm [shape: f32[128,128], index: 4, kind: input, shape index: {}]   ;;  %s1117_s5 = inlined_call_operand.hbm [shape: f32[8,128], index: 5, kind: input, shape index: {}]   ;;  %s1118_s6 = inlined_call_operand.vmem [shape: f32[4,2], index: 6, kind: output, shape index: {}]  }
   0x1   :  { %12 = vsyncpa [#allocation5], 0 }
   0x2   :  { %13 = vsyncpa [#allocation8], 0 }
   0x3   :  { %14 = vsyncpa [#allocation11], 0 }
   0x4   :  { %19 = vsyncadd [#allocation3], 64  ;;  %s929_s21 = smov [#allocation4]   ;;  %s789_s25 = scalar_lea.hbm %s1113_s1, 896 }
   0x5   :  { %s32_s22 = sshll.u32 %s929_s21, 4  ;;  %p790_p0 = scmp.ne.s32.totalorder %s1113_s1, %s789_s25  ;;  %s33_s22 = int_to_ptr.vmem [resolvable:$true] %s32_s22 }
   0x6   :  { %p793_p1 = scmp.lt.u32.totalorder %s789_s25, %s1113_s1 }
   0x8   :  { %p795_p2 = pnand %p793_p1, %p790_p0 }
   0xa   :  { %798 = shalt.err (!%p795_p2)
}
   0xb   :  { %s799_s30 = scalar_lea.vmem %s33_s22, 896  ;;  %p804_p4 = scmp.lt.s32.totalorder %s33_s22, %s33_s22 }
   0xc   :  { %p800_p3 = scmp.ne.s32.totalorder %s33_s22, %s799_s30  ;;  %p805_p5 = scmp.lt.s32.totalorder %s799_s30, %s799_s30 }
   0xe   :  { %p806_p6 = por %p805_p5, %p804_p4 }
  0x10   :  { %p807_p7 = pnand %p806_p6, %p800_p3 }
  0x12   :  { %810 = shalt.err (!%p807_p7)
}
  0x13   :  { %s930_s7 = smov 128   ;;  %s931_s8 = smov 8  }
  0x14   :  { %38 = dma.hbm_to_vmem [thread:$0]  %s1113_s1, 896, %s33_s22, [#allocation5], %s930_s7, %s930_s7, %s931_s8  }
  0x15   :  { %s932_s11 = smov [#allocation7]   ;;  %s933_s13 = smov [#allocation2]  }
  0x16   :  { %s56_s12 = sshll.u32 %s932_s11, 4  ;;  %s20_s14 = sshll.u32 %s933_s13, 4  ;;  %s57_s12 = int_to_ptr.vmem [resolvable:$true] %s56_s12  ;;  %s21_s14 = int_to_ptr.vmem [resolvable:$true] %s20_s14 }
  0x17   :  { %s811_s17 = scalar_lea.hbm %s1115_s3, 2048 }
  0x18   :  { %p812_p8 = scmp.ne.s32.totalorder %s1115_s3, %s811_s17  ;;  %p815_p9 = scmp.lt.u32.totalorder %s811_s17, %s1115_s3 }
  0x1a   :  { %p817_p10 = pnand %p815_p9, %p812_p8 }
  0x1c   :  { %820 = shalt.err (!%p817_p10)
}
  0x1d   :  { %s821_s1 = scalar_lea.vmem %s57_s12, 2048  ;;  %p826_p12 = scmp.lt.s32.totalorder %s57_s12, %s57_s12 }
  0x1e   :  { %p822_p11 = scmp.ne.s32.totalorder %s57_s12, %s821_s1  ;;  %p827_p13 = scmp.lt.s32.totalorder %s821_s1, %s821_s1 }
  0x20   :  { %p828_p0 = por %p827_p13, %p826_p12 }
  0x22   :  { %p829_p1 = pnand %p828_p0, %p822_p11 }
  0x24   :  { %832 = shalt.err (!%p829_p1)
}
  0x25   :  { %62 = dma.hbm_to_vmem [thread:$0]  %s1115_s3, 2048, %s57_s12, [#allocation8], %s930_s7, %s930_s7, %s931_s8  }
  0x26   :  { %s833_s26 = scalar_lea.hbm %s1112_s0, 64 }
  0x27   :  { %p834_p2 = scmp.ne.s32.totalorder %s1112_s0, %s833_s26  ;;  %p837_p3 = scmp.lt.u32.totalorder %s833_s26, %s1112_s0 }
  0x29   :  { %p839_p4 = pnand %p837_p3, %p834_p2 }
  0x2b   :  { %842 = shalt.err (!%p839_p4)
}
  0x2c   :  { %s843_s9 = scalar_lea.vmem %s21_s14, 64  ;;  %s847_s10 = scalar_lea.vmem %s21_s14, 128 }
  0x2d   :  { %p844_p5 = scmp.ne.s32.totalorder %s21_s14, %s843_s9  ;;  %p848_p6 = scmp.lt.s32.totalorder %s21_s14, %s21_s14 }
  0x2e   :  { %p849_p7 = scmp.lt.s32.totalorder %s847_s10, %s843_s9 }
  0x30   :  { %p850_p8 = por %p849_p7, %p848_p6 }
  0x32   :  { %p851_p9 = pnand %p850_p8, %p844_p5 }
  0x34   :  { %854 = shalt.err (!%p851_p9)
}
  0x35   :  { %s934_s3 = smov 64   ;;  %s935_s11 = smov 4  }
  0x36   :  { %26 = dma.hbm_to_vmem [thread:$0]  %s1112_s0, 64, %s21_s14, [#allocation3], %s934_s3, %s934_s3, %s935_s11  }
  0x37   :  { %s936_s15 = smov [#allocation6]   ;;  %s937_s17 = smov [#allocation9]  }
  0x38   :  { %s44_s16 = sshll.u32 %s936_s15, 4  ;;  %s68_s18 = sshll.u32 %s937_s17, 4  ;;  %s45_s16 = int_to_ptr.vmem [resolvable:$true] %s44_s16  ;;  %s69_s18 = int_to_ptr.vmem [resolvable:$true] %s68_s18 }
  0x39   :  { %s855_s21 = scalar_lea.hbm %s1114_s2, 2048 }
  0x3a   :  { %p856_p10 = scmp.ne.s32.totalorder %s1114_s2, %s855_s21  ;;  %p859_p11 = scmp.lt.u32.totalorder %s855_s21, %s1114_s2 }
  0x3c   :  { %p861_p12 = pnand %p859_p11, %p856_p10 }
  0x3e   :  { %864 = shalt.err (!%p861_p12)
}
  0x3f   :  { %s865_s0 = scalar_lea.vmem %s45_s16, 2048  ;;  %p870_p0 = scmp.lt.s32.totalorder %s45_s16, %s45_s16 }
  0x40   :  { %p866_p13 = scmp.ne.s32.totalorder %s45_s16, %s865_s0  ;;  %p871_p1 = scmp.lt.s32.totalorder %s865_s0, %s865_s0 }
  0x42   :  { %p872_p2 = por %p871_p1, %p870_p0 }
  0x44   :  { %p873_p3 = pnand %p872_p2, %p866_p13 }
  0x46   :  { %876 = shalt.err (!%p873_p3)
}
  0x47   :  { %50 = dma.hbm_to_vmem [thread:$0]  %s1114_s2, 2048, %s45_s16, [#allocation5], %s930_s7, %s930_s7, %s931_s8  }
  0x48   :  { %s877_s28 = scalar_lea.hbm %s1116_s4, 2048 }
  0x49   :  { %p878_p4 = scmp.ne.s32.totalorder %s1116_s4, %s877_s28  ;;  %p881_p5 = scmp.lt.u32.totalorder %s877_s28, %s1116_s4 }
  0x4b   :  { %p883_p6 = pnand %p881_p5, %p878_p4 }
  0x4d   :  { %886 = shalt.err (!%p883_p6)
}
  0x4e   :  { %s887_s3 = scalar_lea.vmem %s69_s18, 2048  ;;  %p892_p8 = scmp.lt.s32.totalorder %s69_s18, %s69_s18 }
  0x4f   :  { %p888_p7 = scmp.ne.s32.totalorder %s69_s18, %s887_s3  ;;  %p893_p9 = scmp.lt.s32.totalorder %s887_s3, %s887_s3 }
  0x51   :  { %p894_p10 = por %p893_p9, %p892_p8 }
  0x53   :  { %p895_p11 = pnand %p894_p10, %p888_p7 }
  0x55   :  { %898 = shalt.err (!%p895_p11)
}
  0x56   :  { %74 = dma.hbm_to_vmem [thread:$0]  %s1116_s4, 2048, %s69_s18, [#allocation8], %s930_s7, %s930_s7, %s931_s8  }
  0x57   :  { %s938_s12 = smov [#allocation10]   ;;  %s899_s17 = scalar_lea.hbm %s1117_s5, 128 }
  0x58   :  { %s81_s13 = sshll.u32 %s938_s12, 4  ;;  %p900_p12 = scmp.ne.s32.totalorder %s1117_s5, %s899_s17  ;;  %s82_s13 = int_to_ptr.vmem [resolvable:$true] %s81_s13 }
  0x59   :  { %p903_p13 = scmp.lt.u32.totalorder %s899_s17, %s1117_s5 }
  0x5b   :  { %p905_p0 = pnand %p903_p13, %p900_p12 }
  0x5d   :  { %908 = shalt.err (!%p905_p0)
}
  0x5e   :  { %s909_s22 = scalar_lea.vmem %s82_s13, 128  ;;  %p914_p2 = scmp.lt.s32.totalorder %s82_s13, %s82_s13 }
  0x5f   :  { %p910_p1 = scmp.ne.s32.totalorder %s82_s13, %s909_s22  ;;  %p915_p3 = scmp.lt.s32.totalorder %s909_s22, %s909_s22 }
  0x61   :  { %p916_p4 = por %p915_p3, %p914_p2 }
  0x63   :  { %p917_p5 = pnand %p916_p4, %p910_p1 }
  0x65   :  { %920 = shalt.err (!%p917_p5)
}
  0x66   :  { %84 = dma.hbm_to_vmem [thread:$0]  %s1117_s5, 128, %s82_s13, [#allocation11]  }
  0x67   :  { %921 = dma.done.wait [#allocation3], 128  }
  0x68   :  { %922 = vsyncadd [#allocation3], 4294967168 }
  0x69   :  { %923 = dma.done.wait [#allocation5], 2944  }
  0x6a   :  { %924 = vsyncadd [#allocation5], 4294964352 }
  0x6b   :  { %925 = dma.done.wait [#allocation8], 4096  }
  0x6c   :  { %926 = vsyncadd [#allocation8], 4294963200 }
  0x6d   :  { %927 = dma.done.wait [#allocation11], 128  }
  0x6e   :  { %928 = vsyncadd [#allocation11], 4294967168  ;;  %v939_v0 = vmov 0.0|0.0   ;;  %vm940_vm0 = vmmov 0   ;;  %v941_v1 = vmov 0.0   ;;  %v105_v2 = vld [vmem:[#allocation4] sm:$0xff]  ;;  %v112_v58 = vlaneseq }
  0x6f   :  { %695 = vmatprep.subr.bf16.mxu0 %v939_v0  ;;  %587 = vmatprep.mubr.msk.f32.mxu0 %vm940_vm0, %v941_v1  ;;  %v106_v3 = vld [vmem:[#allocation4 + $0x8] sm:$0xff]  ;;  %v107_v4 = vld [vmem:[#allocation4 + $0x10] sm:$0xff]  ;;  %v108_v6 = vld [vmem:[#allocation4 + $0x18] sm:$0xff]  ;;  %vm120_vm1 = vcmask 1041408   ;;  %vm116_vm2 = vcmask 408576   ;;  %vm467_vm3 = vcmask 15360  }
  0x70   :  { %704 = vmatprep.subr.bf16.mxu1 %v939_v0  ;;  %622 = vmatprep.mubr.msk.f32.mxu1 %vm940_vm0, %v941_v1  ;;  %v696_v5 = vpack.c.bf16 %v106_v3, %v105_v2  ;;  %v195_v7 = vld [vmem:[#allocation6] sm:$0xff]  ;;  %v699_v8 = vpack.c.bf16 %v108_v6, %v107_v4  ;;  %v196_v9 = vld [vmem:[#allocation6 + $0x8] sm:$0xff]  ;;  %v197_v10 = vld [vmem:[#allocation6 + $0x10] sm:$0xff]  ;;  %v1088_v59 = vshrl.u32 %v112_v58, 7 }
  0x71   :  { %v198_v11 = vld [vmem:[#allocation6 + $0x18] sm:$0xff]  ;;  %v109_v12 = vld [vmem:[#allocation4 + $0x20] sm:$0xff]  ;;  %v110_v13 = vld [vmem:[#allocation4 + $0x28] sm:$0xff]  ;;  %v705_v14 = vpack.c.bf16 %v196_v9, %v195_v7 }
  0x72   :  { %697 = vmatpush3.bf16.msra.mxu0 %v696_v5  ;;  %v708_v15 = vpack.c.bf16 %v198_v11, %v197_v10  ;;  %v702_v16 = vpack.c.bf16 %v110_v13, %v109_v12  ;;  %v199_v17 = vld [vmem:[#allocation6 + $0x20] sm:$0xff]  ;;  %v200_v18 = vld [vmem:[#allocation6 + $0x28] sm:$0xff]  ;;  %v201_v20 = vld [vmem:[#allocation6 + $0x30] sm:$0xff]  ;;  %v114_v60 = vsub.s32 0, %v1088_v59 }
  0x73   :  { %698 = vmatprep.subr.bf16.mxu0 %v939_v0  ;;  %706 = vmatpush3.bf16.msra.mxu1 %v705_v14  ;;  %v711_v19 = vpack.c.bf16 %v200_v18, %v199_v17  ;;  %v202_v21 = vld [vmem:[#allocation6 + $0x38] sm:$0xff]  ;;  %v103_v23 = vld [vmem:[#allocation2] sm:$0xff]  ;;  %v204_v26 = vld [vmem:[#allocation6 + $0x48] sm:$0xff] }
  0x74   :  { %707 = vmatprep.subr.bf16.mxu1 %v939_v0  ;;  %v111_v22 = vld [vmem:[#allocation4 + $0x30] sm:$0x3]  ;;  %v714_v24 = vpack.c.bf16 %v202_v21, %v201_v20  ;;  %v203_v25 = vld [vmem:[#allocation6 + $0x40] sm:$0xff]  ;;  %v205_v28 = vld [vmem:[#allocation6 + $0x50] sm:$0xff] }
  0x75   :  { %v717_v27 = vpack.c.bf16 %v204_v26, %v203_v25  ;;  %v206_v29 = vld [vmem:[#allocation6 + $0x58] sm:$0xff]  ;;  %v207_v31 = vld [vmem:[#allocation6 + $0x60] sm:$0xff]  ;;  %v208_v32 = vld [vmem:[#allocation6 + $0x68] sm:$0xff] }
  0x76   :  { %700 = vmatpush3.bf16.msra.mxu0 %v699_v8  ;;  %v720_v30 = vpack.c.bf16 %v206_v29, %v205_v28  ;;  %v723_v33 = vpack.c.bf16 %v208_v32, %v207_v31  ;;  %v209_v34 = vld [vmem:[#allocation6 + $0x70] sm:$0xff]  ;;  %v210_v35 = vld [vmem:[#allocation6 + $0x78] sm:$0xff]  ;;  %v286_v37 = vld [vmem:[#allocation7] sm:$0xff]  ;;  %v213_v28 = vsub.s32 1, %v1088_v59 }
  0x77   :  { %701 = vmatprep.subr.bf16.mxu0 %v939_v0  ;;  %709 = vmatpush3.bf16.msra.mxu1 %v708_v15  ;;  %v726_v36 = vpack.c.bf16 %v210_v35, %v209_v34  ;;  %v287_v38 = vld [vmem:[#allocation7 + $0x8] sm:$0xff]  ;;  %v288_v39 = vld [vmem:[#allocation7 + $0x10] sm:$0xff]  ;;  %v289_v41 = vld [vmem:[#allocation7 + $0x18] sm:$0xff] }
  0x78   :  { %710 = vmatprep.subr.bf16.mxu1 %v939_v0  ;;  %v729_v40 = vpack.c.bf16 %v287_v38, %v286_v37  ;;  %v732_v42 = vpack.c.bf16 %v289_v41, %v288_v39  ;;  %v290_v43 = vld [vmem:[#allocation7 + $0x20] sm:$0xff]  ;;  %v291_v44 = vld [vmem:[#allocation7 + $0x28] sm:$0xff]  ;;  %v292_v46 = vld [vmem:[#allocation7 + $0x30] sm:$0xff]  ;;  %v304_v37 = vsub.s32 2, %v1088_v59 }
  0x79   :  { %v735_v45 = vpack.c.bf16 %v291_v44, %v290_v43  ;;  %v293_v47 = vld [vmem:[#allocation7 + $0x38] sm:$0xff]  ;;  %v294_v49 = vld [vmem:[#allocation7 + $0x40] sm:$0xff]  ;;  %v295_v50 = vld [vmem:[#allocation7 + $0x48] sm:$0xff] }
  0x7a   :  { %703 = vmatpush3.bf16.msra.mxu0 %v702_v16  ;;  %v738_v48 = vpack.c.bf16 %v293_v47, %v292_v46  ;;  %v741_v51 = vpack.c.bf16 %v295_v50, %v294_v49  ;;  %v296_v52 = vld [vmem:[#allocation7 + $0x50] sm:$0xff]  ;;  %v297_v53 = vld [vmem:[#allocation7 + $0x58] sm:$0xff]  ;;  %v298_v55 = vld [vmem:[#allocation7 + $0x60] sm:$0xff] }
  0x7b   :  { %585 = vmatprep.subr.mxu0 %v941_v1  ;;  %712 = vmatpush3.bf16.msra.mxu1 %v711_v19  ;;  %v744_v54 = vpack.c.bf16 %v297_v53, %v296_v52  ;;  %v299_v56 = vld [vmem:[#allocation7 + $0x68] sm:$0xff]  ;;  %v1091_v61 = vld [vmem:[#allocation10] sm:$0xff]  ;;  %v300_v5 = vld [vmem:[#allocation7 + $0x70] sm:$0xff] }
  0x7c   :  { %713 = vmatprep.subr.bf16.mxu1 %v939_v0  ;;  %v747_v57 = vpack.c.bf16 %v299_v56, %v298_v55  ;;  %v115_v62 = vrot.slane %v1091_v61, %v114_v60  ;;  %v301_v6 = vld [vmem:[#allocation7 + $0x78] sm:$0xff]  ;;  %v377_v8 = vld [vmem:[#allocation9] sm:$0xff]  ;;  %v378_v9 = vld [vmem:[#allocation9 + $0x8] sm:$0xff]  ;;  %v214_v29 = vrot.slane %v1091_v61, %v213_v28  ;;  %v305_v38 = vrot.slane %v1091_v61, %v304_v37 }
  0x7d   :  { %v750_v7 = vpack.c.bf16 %v301_v6, %v300_v5  ;;  %v379_v10 = vld [vmem:[#allocation9 + $0x10] sm:$0xff]  ;;  %v753_v11 = vpack.c.bf16 %v378_v9, %v377_v8  ;;  %v380_v12 = vld [vmem:[#allocation9 + $0x18] sm:$0xff]  ;;  %v381_v14 = vld [vmem:[#allocation9 + $0x20] sm:$0xff] }
  0x7e   :  { %586 = vmatpush3.msk.msra.mxu0 %vm120_vm1, %v111_v22  ;;  %v756_v13 = vpack.c.bf16 %v380_v12, %v379_v10  ;;  %v382_v15 = vld [vmem:[#allocation9 + $0x28] sm:$0xff]  ;;  %v384_v17 = vld [vmem:[#allocation9 + $0x38] sm:$0xff]  ;;  %v385_v19 = vld [vmem:[#allocation9 + $0x40] sm:$0xff] }
  0x7f   :  { %588 = vmatmul.mubr.msk.f32.vlgmr.msra.gmra.mrb[0].mxu0 %vm116_vm2, %v103_v23  ;;  %728 = vmatprep.subr.bf16.mxu0 %v939_v0  ;;  %v759_v16 = vpack.c.bf16 %v382_v15, %v381_v14  ;;  %v386_v20 = vld [vmem:[#allocation9 + $0x48] sm:$0xff]  ;;  %v387_v22 = vld [vmem:[#allocation9 + $0x50] sm:$0xff]  ;;  %v388_v23 = vld [vmem:[#allocation9 + $0x58] sm:$0xff] }
  0x80   :  { %657 = vmatprep.mubr.msk.f32.mxu0 %vm940_vm0, %v941_v1  ;;  %715 = vmatpush3.bf16.msra.mxu1 %v714_v24  ;;  %v765_v21 = vpack.c.bf16 %v386_v20, %v385_v19  ;;  %v768_v24 = vpack.c.bf16 %v388_v23, %v387_v22  ;;  %v389_v25 = vld [vmem:[#allocation9 + $0x60] sm:$0xff]  ;;  %v390_v26 = vld [vmem:[#allocation9 + $0x68] sm:$0xff]  ;;  %v391_v34 = vld [vmem:[#allocation9 + $0x70] sm:$0xff] }
  0x81   :  { %716 = vmatprep.subr.bf16.mxu1 %v939_v0  ;;  %730 = vmatpush3.bf16.msra.mxu0 %v729_v40  ;;  %v392_v35 = vld [vmem:[#allocation9 + $0x78] sm:$0xff] }
  0x82   :  { %731 = vmatprep.subr.bf16.mxu0 %v939_v0 }
  0x84   :  { %718 = vmatpush3.bf16.msra.mxu1 %v717_v27  ;;  %v771_v27 = vpack.c.bf16 %v390_v26, %v389_v25 }
  0x85   :  { %719 = vmatprep.subr.bf16.mxu1 %v939_v0  ;;  %733 = vmatpush3.bf16.msra.mxu0 %v732_v42  ;;  %v395_v42 = vsub.s32 3, %v1088_v59 }
  0x86   :  { %734 = vmatprep.subr.bf16.mxu0 %v939_v0 }
  0x87   :  { %v396_v43 = vrot.slane %v1091_v61, %v395_v42 }
  0x88   :  { %721 = vmatpush3.bf16.msra.mxu1 %v720_v30 }
  0x89   :  { %722 = vmatprep.subr.bf16.mxu1 %v939_v0  ;;  %736 = vmatpush3.bf16.msra.mxu0 %v735_v45 }
  0x8a   :  { %737 = vmatprep.subr.bf16.mxu0 %v939_v0 }
  0x8c   :  { %724 = vmatpush3.bf16.msra.mxu1 %v723_v33 }
  0x8d   :  { %725 = vmatprep.subr.bf16.mxu1 %v939_v0  ;;  %739 = vmatpush3.bf16.msra.mxu0 %v738_v48 }
  0x8e   :  { %740 = vmatprep.subr.bf16.mxu0 %v939_v0 }
  0x90   :  { %727 = vmatpush3.bf16.msra.mxu1 %v726_v36  ;;  %v774_v36 = vpack.c.bf16 %v392_v35, %v391_v34 }
  0x91   :  { %752 = vmatprep.subr.bf16.mxu1 %v939_v0  ;;  %742 = vmatpush3.bf16.msra.mxu0 %v741_v51 }
  0x92   :  { %743 = vmatprep.subr.bf16.mxu0 %v939_v0 }
  0x95   :  { %745 = vmatpush3.bf16.msra.mxu0 %v744_v54 }
  0x96   :  { %746 = vmatprep.subr.bf16.mxu0 %v939_v0 }
  0x99   :  { %748 = vmatpush3.bf16.msra.mxu0 %v747_v57 }
  0x9a   :  { %749 = vmatprep.subr.bf16.mxu0 %v939_v0 }
  0x9d   :  { %751 = vmatpush3.bf16.msra.mxu0 %v750_v7 }
 0x152   :  { %v190_v63 = vpop.f32.mrb[0].mxu0 }
 0x153   :  { %v191_v2 = vadd.f32 %v190_v63, %v115_v62  ;;  %v589_v3 = vpop.f32.mrb[1].mxu0 }
 0x155   :  { %v194_v4 = vmax.f32 %v191_v2, 0.0 }
 0x157   :  { %623 = vmatmul.mubr.f32.vlgmr.msra.gmra.mrb[0].mxu1 %v194_v4 }
 0x158   :  { %692 = vmatprep.mubr.msk.f32.mxu1 %vm940_vm0, %v941_v1  ;;  %754 = vmatpush3.bf16.msra.mxu1 %v753_v11  ;;  %v383_v1 = vld [vmem:[#allocation9 + $0x30] sm:$0xff] }
 0x159   :  { %755 = vmatprep.subr.bf16.mxu1 %v939_v0  ;;  %v762_v18 = vpack.c.bf16 %v384_v17, %v383_v1 }
 0x15c   :  { %757 = vmatpush3.bf16.msra.mxu1 %v756_v13 }
 0x15d   :  { %758 = vmatprep.subr.bf16.mxu1 %v939_v0 }
 0x160   :  { %760 = vmatpush3.bf16.msra.mxu1 %v759_v16 }
 0x161   :  { %761 = vmatprep.subr.bf16.mxu1 %v939_v0 }
 0x164   :  { %763 = vmatpush3.bf16.msra.mxu1 %v762_v18 }
 0x165   :  { %764 = vmatprep.subr.bf16.mxu1 %v939_v0 }
 0x168   :  { %766 = vmatpush3.bf16.msra.mxu1 %v765_v21 }
 0x169   :  { %767 = vmatprep.subr.bf16.mxu1 %v939_v0 }
 0x16c   :  { %769 = vmatpush3.bf16.msra.mxu1 %v768_v24 }
 0x16d   :  { %770 = vmatprep.subr.bf16.mxu1 %v939_v0 }
 0x170   :  { %772 = vmatpush3.bf16.msra.mxu1 %v771_v27 }
 0x171   :  { %773 = vmatprep.subr.bf16.mxu1 %v939_v0 }
 0x174   :  { %775 = vmatpush3.bf16.msra.mxu1 %v774_v36 }
 0x22a   :  { %v281_v30 = vpop.f32.mrb[0].mxu1 }
 0x22b   :  { %v282_v31 = vadd.f32 %v281_v30, %v214_v29  ;;  %v624_v32 = vpop.f32.mrb[1].mxu1 }
 0x22d   :  { %v285_v33 = vmax.f32 %v282_v31, 0.0 }
 0x22f   :  { %658 = vmatmul.mubr.f32.vlgmr.msra.gmra.mrb[2].mxu0 %v285_v33 }
 0x302   :  { %v372_v39 = vpop.f32.mrb[2].mxu0 }
 0x303   :  { %v373_v40 = vadd.f32 %v372_v39, %v305_v38  ;;  %v659_v0 = vpop.f32.mrb[3].mxu0 }
 0x305   :  { %v376_v41 = vmax.f32 %v373_v40, 0.0 }
 0x307   :  { %693 = vmatmul.mubr.f32.vlgmr.msra.gmra.mrb[2].mxu1 %v376_v41 }
 0x3da   :  { %v463_v44 = vpop.f32.mrb[2].mxu1 }
 0x3db   :  { %v464_v45 = vadd.f32 %v463_v44, %v396_v43  ;;  %v694_v46 = vpop.f32.mrb[3].mxu1 }
 0x3dd   :  { %468 = vst.msk [vmem:[#allocation12] sm:$0xff] %vm467_vm3, %v464_v45 }
 0x3e4   :  { %v486_v47 = vld [vmem:[#allocation12] sm:$0xf] }
 0x3e5   :  { %487 = vst [vmem:[%s1118_s6] sm:$0xf] %v486_v47 }
 0x3e6   :  { %504 = vsyncpa [#allocation3], 1 }
 0x3e7   :  { %505 = vsyncpa [#allocation5], 1 }
 0x3e8   :  { %506 = vsyncpa [#allocation8], 1 }
 0x3e9   :  { %507 = vsyncpa [#allocation11], 1 }

</bundles_post_ra>
